<compile_context>
chip_gen: v5e
topology: v5e:2x2
jax: 0.10.0
libtpu: 0.0.40
codegen_flags: <defaults>
</compile_context>

<pallas_src>
import functools

import jax
import jax.numpy as jnp
from jax import lax
from jax.experimental import pallas as pl
from jax.experimental.pallas import tpu as pltpu

_LANES = 128
_SUBLANES = 8
_TR_TARGET = 2048      # target rows per tile (≈1 MiB f32 per operand block)
_NUM_CORES = 2         # leading "parallel" axis; uses both TCs on v7x


def _cdiv(a, b):
    return -(-a // b)


def _round_up(x, m):
    return _cdiv(x, m) * m


def _landmark_kernel(pts_ref, tru_ref, msk_ref, out_ref, acc_ref, *,
                     rows, tr, tiles_per_core):
    c = pl.program_id(0)          # core / outer split  ("parallel")
    i = pl.program_id(1)          # row-tile within the split ("arbitrary")

    @pl.when(i == 0)
    def _():
        acc_ref[...] = jnp.zeros_like(acc_ref)

    # Native-dtype loads, upcast to f32 for the arithmetic.
    p = pts_ref[...].astype(jnp.float32)
    t = tru_ref[...].astype(jnp.float32)
    m = msk_ref[...].astype(jnp.float32)
    err = jnp.abs((p - t) * m)                       # |(points - true) * mask|

    # Zero rows past the logical end of the data (ragged last tile).  Select
    # guards against any unspecified values read in the out-of-bounds region.
    row0 = (c * tiles_per_core + i) * tr
    local_row = lax.broadcasted_iota(jnp.int32, err.shape, 0)
    err = jnp.where(row0 + local_row < rows, err, 0.0)

    acc_ref[...] += err                              # pure VPU adds

    @pl.when(i == pl.num_programs(1) - 1)
    def _():
        # Fold the (tr,128) accumulator to an (8,128) lane-dense partial block
        # (sublane-group adds only); the final tiny reduction runs in XLA.
        folded = jnp.sum(acc_ref[...].reshape(tr // _SUBLANES, _SUBLANES, _LANES),
                         axis=0)
        out_ref[...] = folded[None]


def landmark_loss(points, true, mask):
    """points, true: (B, N, D) float; mask: (B, N, M) float. Returns scalar f32."""
    B, N, D = points.shape
    P = B * N
    L = P * D

    if true.dtype != points.dtype:
        true = true.astype(points.dtype)

    m = mask[:, :, 1]
    if not jnp.issubdtype(m.dtype, jnp.floating):
        m = m.astype(jnp.float32)
    # Per-element mask: broadcast the per-point mask across the D coordinates.
    msk = jnp.broadcast_to(m[:, :, None], (B, N, D)).reshape(L)

    # Natural flat order -> lane-dense (rows, 128).  Copy-free when L % 128 == 0
    # (and L large enough); otherwise only a small zero tail is appended
    # (0 - 0 = 0 and mask 0 => zero contribution).
    pts = points.reshape(L)
    tru = true.reshape(L)

    min_elems = _NUM_CORES * _SUBLANES * _LANES      # >= one full (8,128) tile per core
    L_pad = max(_round_up(L, _LANES), min_elems)
    if L_pad != L:
        pts = jnp.pad(pts, (0, L_pad - L))
        tru = jnp.pad(tru, (0, L_pad - L))
        msk = jnp.pad(msk, (0, L_pad - L))

    rows = L_pad // _LANES
    pts = pts.reshape(rows, _LANES)
    tru = tru.reshape(rows, _LANES)
    msk = msk.reshape(rows, _LANES)

    # Tile plan: pick the tile count first (bounds zero-pad DMA to <8 rows/tile),
    # then the tile size; tr <= 2048 keeps live VMEM ~7 MiB on every generation.
    tiles_per_core = _cdiv(_cdiv(rows, _TR_TARGET), _NUM_CORES)
    tiles_total = tiles_per_core * _NUM_CORES
    tr = _round_up(_cdiv(rows, tiles_total), _SUBLANES)
    # Invariant: every tile starts in-bounds (ragged tails handled in-kernel).
    assert (tiles_total - 1) * tr < rows, "internal tiling invariant violated"

    def in_map(c, i):
        return (c * tiles_per_core + i, 0)

    kernel = functools.partial(_landmark_kernel, rows=rows, tr=tr,
                               tiles_per_core=tiles_per_core)

    in_bytes = rows * _LANES * (2 * jnp.dtype(points.dtype).itemsize
                                + jnp.dtype(msk.dtype).itemsize)
    out_bytes = _NUM_CORES * _SUBLANES * _LANES * 4

    partials = pl.pallas_call(
        kernel,
        out_shape=jax.ShapeDtypeStruct((_NUM_CORES, _SUBLANES, _LANES), jnp.float32),
        grid=(_NUM_CORES, tiles_per_core),
        in_specs=[
            pl.BlockSpec((tr, _LANES), in_map),
            pl.BlockSpec((tr, _LANES), in_map),
            pl.BlockSpec((tr, _LANES), in_map),
        ],
        out_specs=pl.BlockSpec((1, _SUBLANES, _LANES), lambda c, i: (c, 0, 0)),
        scratch_shapes=[pltpu.VMEM((tr, _LANES), jnp.float32)],
        compiler_params=pltpu.CompilerParams(
            dimension_semantics=("parallel", "arbitrary")),
        cost_estimate=pl.CostEstimate(
            flops=5 * rows * _LANES,
            transcendentals=0,
            bytes_accessed=int(in_bytes + out_bytes)),
    )(pts, tru, msk)

    # Final tiny reduction (2*8*128 values) + mean normalization in XLA.
    return jnp.sum(partials) / P


if __name__ == "__main__":
    key = jax.random.PRNGKey(0)
    k1, k2, k3 = jax.random.split(key, 3)

    B, N, D, M = 2, 8, 2, 2
    points = jax.random.normal(k1, (B, N, D), dtype=jnp.float32)
    true = jax.random.normal(k2, (B, N, D), dtype=jnp.float32)
    mask = (jax.random.uniform(k3, (B, N, M)) > 0.5).astype(jnp.float32)

    loss = landmark_loss(points, true, mask)
    jax.block_until_ready(loss)

    # Pure-JAX reference (same math as the PyTorch module).
    ref = jnp.mean(jnp.sum(jnp.abs((points - true) * mask[:, :, 1:2]), axis=2))
    assert jnp.allclose(loss, ref, rtol=1e-5, atol=1e-6), (loss, ref)

    print("KERNEL_OK")
</pallas_src>

<mosaic_0001>
module attributes {stable_mosaic.version = 11 : i64} {
  func.func @_landmark_kernel(%arg0: i32, %arg1: i32, %arg2: memref<8x128xf32, #tpu.memory_space<vmem>>, %arg3: memref<8x128xf32, #tpu.memory_space<vmem>>, %arg4: memref<8x128xf32, #tpu.memory_space<vmem>>, %arg5: memref<1x8x128xf32, #tpu.memory_space<vmem>>, %arg6: memref<8x128xf32, #tpu.memory_space<vmem>>) attributes {dimension_semantics = [#tpu.dimension_semantics<parallel>, #tpu.dimension_semantics<arbitrary>], iteration_bounds = array<i64: 2, 1>, scalar_prefetch = 0 : i64, scratch_operands = 1 : i64, tpu.core_type = #tpu.core_type<tc>, window_params = [{transform_indices = @transform_0, window_bounds = array<i64: 8, 128>}, {transform_indices = @transform_1, window_bounds = array<i64: 8, 128>}, {transform_indices = @transform_2, window_bounds = array<i64: 8, 128>}, {transform_indices = @transform_3, window_bounds = array<i64: 1, 8, 128>}]} {
    %c0_i32 = arith.constant 0 : i32
    %0 = arith.cmpi eq, %arg1, %c0_i32 : i32
    %1 = arith.extui %0 : i1 to i32
    %c0_i32_0 = arith.constant 0 : i32
    %2 = arith.cmpi ne, %1, %c0_i32_0 : i32
    scf.if %2 {
      %cst_12 = arith.constant 0.000000e+00 : f32
      %25 = vector.broadcast %cst_12 : f32 to vector<8x128xf32>
      %c0_13 = arith.constant 0 : index
      %c0_14 = arith.constant 0 : index
      %26 = vector.load %arg6[%c0_13, %c0_14] : memref<8x128xf32, #tpu.memory_space<vmem>>, vector<8x128xf32>
      tpu.vector_store %arg6[%c0_13, %c0_14], %25 {strides = array<i32>} : memref<8x128xf32, #tpu.memory_space<vmem>>, vector<8x128xf32>,
    } else {
    }
    %c0 = arith.constant 0 : index
    %c0_1 = arith.constant 0 : index
    %3 = vector.load %arg2[%c0, %c0_1] : memref<8x128xf32, #tpu.memory_space<vmem>>, vector<8x128xf32>
    %c0_2 = arith.constant 0 : index
    %c0_3 = arith.constant 0 : index
    %4 = vector.load %arg3[%c0_2, %c0_3] : memref<8x128xf32, #tpu.memory_space<vmem>>, vector<8x128xf32>
    %c0_4 = arith.constant 0 : index
    %c0_5 = arith.constant 0 : index
    %5 = vector.load %arg4[%c0_4, %c0_5] : memref<8x128xf32, #tpu.memory_space<vmem>>, vector<8x128xf32>
    %6 = arith.subf %3, %4 : vector<8x128xf32>
    %7 = arith.mulf %6, %5 : vector<8x128xf32>
    %8 = math.absf %7 : vector<8x128xf32>
    %c1_i32 = arith.constant 1 : i32
    %9 = arith.muli %arg0, %c1_i32 : i32
    %10 = arith.addi %9, %arg1 : i32
    %c8_i32 = arith.constant 8 : i32
    %11 = arith.muli %10, %c8_i32 : i32
    %12 = tpu.iota {dimensions = array<i32: 0>} : vector<8x128xi32>
    %13 = vector.broadcast %11 : i32 to vector<8x128xi32>
    %14 = arith.addi %13, %12 : vector<8x128xi32>
    %c16_i32 = arith.constant 16 : i32
    %15 = vector.broadcast %c16_i32 : i32 to vector<8x128xi32>
    %16 = arith.cmpi slt, %14, %15 : vector<8x128xi32>
    %cst = arith.constant 0.000000e+00 : f32
    %17 = vector.broadcast %cst : f32 to vector<8x128xf32>
    %18 = arith.select %16, %8, %17 : vector<8x128xi1>, vector<8x128xf32>
    %c0_6 = arith.constant 0 : index
    %c0_7 = arith.constant 0 : index
    %19 = vector.load %arg6[%c0_6, %c0_7] : memref<8x128xf32, #tpu.memory_space<vmem>>, vector<8x128xf32>
    %20 = arith.addf %19, %18 : vector<8x128xf32>
    %c0_8 = arith.constant 0 : index
    %c0_9 = arith.constant 0 : index
    %21 = vector.load %arg6[%c0_8, %c0_9] : memref<8x128xf32, #tpu.memory_space<vmem>>, vector<8x128xf32>
    tpu.vector_store %arg6[%c0_8, %c0_9], %20 {strides = array<i32>} : memref<8x128xf32, #tpu.memory_space<vmem>>, vector<8x128xf32>,
    %c0_i32_10 = arith.constant 0 : i32
    %22 = arith.cmpi eq, %arg1, %c0_i32_10 : i32
    %23 = arith.extui %22 : i1 to i32
    %c0_i32_11 = arith.constant 0 : i32
    %24 = arith.cmpi ne, %23, %c0_i32_11 : i32
    scf.if %24 {
      %c0_12 = arith.constant 0 : index
      %c0_13 = arith.constant 0 : index
      %25 = vector.load %arg6[%c0_12, %c0_13] : memref<8x128xf32, #tpu.memory_space<vmem>>, vector<8x128xf32>
      %26 = vector.shape_cast %25 : vector<8x128xf32> to vector<1x8x128xf32>
      %cst_14 = arith.constant dense<0.000000e+00> : vector<8x128xf32>
      %27 = vector.multi_reduction <add>, %26, %cst_14 [0] : vector<1x8x128xf32> to vector<8x128xf32>
      %28 = vector.shape_cast %27 : vector<8x128xf32> to vector<1x8x128xf32>
      %c0_15 = arith.constant 0 : index
      %c0_16 = arith.constant 0 : index
      %c0_17 = arith.constant 0 : index
      %29 = vector.load %arg5[%c0_15, %c0_16, %c0_17] : memref<1x8x128xf32, #tpu.memory_space<vmem>>, vector<1x8x128xf32>
      tpu.vector_store %arg5[%c0_15, %c0_16, %c0_17], %28 {strides = array<i32>} : memref<1x8x128xf32, #tpu.memory_space<vmem>>, vector<1x8x128xf32>,
    } else {
    }
    return
  }
  func.func @transform_0(%arg0: i32, %arg1: i32) -> (i32, i32) {
    %c1_i32 = arith.constant 1 : i32
    %0 = arith.muli %arg0, %c1_i32 : i32
    %1 = arith.addi %0, %arg1 : i32
    %c0_i32 = arith.constant 0 : i32
    %c0_i32_0 = arith.constant 0 : i32
    return %1, %c0_i32 : i32, i32
  }
  func.func @transform_1(%arg0: i32, %arg1: i32) -> (i32, i32) {
    %c1_i32 = arith.constant 1 : i32
    %0 = arith.muli %arg0, %c1_i32 : i32
    %1 = arith.addi %0, %arg1 : i32
    %c0_i32 = arith.constant 0 : i32
    %c0_i32_0 = arith.constant 0 : i32
    return %1, %c0_i32 : i32, i32
  }
  func.func @transform_2(%arg0: i32, %arg1: i32) -> (i32, i32) {
    %c1_i32 = arith.constant 1 : i32
    %0 = arith.muli %arg0, %c1_i32 : i32
    %1 = arith.addi %0, %arg1 : i32
    %c0_i32 = arith.constant 0 : i32
    %c0_i32_0 = arith.constant 0 : i32
    return %1, %c0_i32 : i32, i32
  }
  func.func @transform_3(%arg0: i32, %arg1: i32) -> (i32, i32, i32) {
    %c0_i32 = arith.constant 0 : i32
    %c0_i32_0 = arith.constant 0 : i32
    %c0_i32_1 = arith.constant 0 : i32
    return %arg0, %c0_i32, %c0_i32_0 : i32, i32, i32
  }
}

</mosaic_0001>

<bundles_post_ra>
// kernel: tpu_custom_call.1
= control target key start
LH: loop header
LB: loop body
LE: loop exit
PB: predicated region body
PF: predicated region fallthrough
CT: control target
= control target key end

     0   :  { %s903_s0 = inlined_call_operand.hbm [shape: f32[16,128], index: 0, kind: input, shape index: {}]   ;;  %s904_s1 = inlined_call_operand.hbm [shape: f32[16,128], index: 1, kind: input, shape index: {}]   ;;  %s905_s2 = inlined_call_operand.hbm [shape: f32[16,128], index: 2, kind: input, shape index: {}]   ;;  %s906_s3 = inlined_call_operand.hbm [shape: f32[2,8,128], index: 3, kind: output, shape index: {}]  }
   0x1   :  { %909 = sst [smem:[#allocation16_spill]] %s904_s1 }
   0x2   :  { %8 = vsyncpa [#allocation4], 0 }
   0x3   :  { %10 = vsyncpa [#allocation4 + $0x1], 0 }
   0x4   :  { %11 = vsyncpa [#allocation7], 0 }
   0x5   :  { %13 = vsyncpa [#allocation7 + $0x1], 0 }
   0x6   :  { %14 = vsyncpa [#allocation5], 0 }
   0x7   :  { %16 = vsyncpa [#allocation5 + $0x1], 0  ;;  %s745_s12 = smov 0   ;;  %s747_s13 = smov 0  }
   0x8   :  { %s749_s14 = smov 0   ;;  %s751_s15 = smov 0  }
   0x9   :  { %s753_s16 = smov 0   ;;  %s755_s17 = smov 0  }
   0xa LB: > { %910 = sst [smem:[#allocation13_spill]] %s719_s16  ;;  %s776_s18 = sadd.s32 4294967295, %s723_s17   ;;  %s723_s17 = sphi %s755_s17, %s22_s17   ;;  %s719_s16 = sphi %s753_s16, %s922_s16   ;;  %s715_s15 = sphi %s751_s15, %s921_s15   ;;  %s711_s14 = sphi %s749_s14, %s925_s14   ;;  %s707_s13 = sphi %s747_s13, %s924_s13   ;;  %s703_s12 = sphi %s745_s12, %s923_s12  }
   0xb   : > { %s456_s19 = sadd.s32 4294967294, %s723_s17   ;;  %s34_s20 = sadd.s32 1, %s719_s16 }
   0xc   : > { %s43_s21 = sadd.s32 1, %s711_s14  ;;  %p36_p0 = scmp.ge.s32.totalorder %s34_s20, 2 }
   0xd   : > { %p50_p1 = scmp.ne.s32.totalorder %s711_s14, %s707_s13  ;;  %p51_p2 = scmp.eq.s32.totalorder %s723_s17, 0 }
   0xe   : > { %p56_p3 = scmp.ne.s32.totalorder %s707_s13, %s703_s12  ;;  %s927_s20 = smov (%p36_p0, %s34_s20), 0 }
   0xf   : > { %911 = sst [smem:[#allocation14_spill]] %s927_s20  ;;  %p788_p4 = por %p51_p2, %p50_p1 }
  0x10   : > { %p57_p5 = scmp.eq.s32.totalorder %s776_s18, 0  ;;  %s40_s23 = ssub.s32 %s719_s16, %s927_s20 }
  0x11   : > { %p136_p6 = scmp.eq.s32.totalorder %s776_s18, 1  ;;  %p41_p7 = scmp.eq.s32.totalorder %s40_s23, 0 }
  0x12   : > { %p796_p8 = por %p57_p5, %p56_p3  ;;  %p142_p10 = scmp.eq.s32.totalorder %s456_s19, 1 }
  0x13   : > { %p800_p9 = por %p136_p6, %p50_p1  ;;  %p458_p12 = scmp.ge.s32.totalorder %s723_s17, 2 }
  0x14   : > { %s805_s26 = scalar_select %p41_p7, %s711_s14, %s43_s21  }
  0x15   : > { %p807_p11 = por %p142_p10, %p56_p3  ;;  %p497_p13 = scmp.lt.s32.totalorder %s723_s17, 2 }
  0x16   : > { %915 = sst [smem:[#allocation15_spill]] %s805_s26  ;;  %s162_s28 = sand.u32 1, %s711_s14  }
  0x17   : > { %s459_s29 = sshll.u32 %s162_s28, 3  ;;  %s460_s30 = sshll.u32 %s719_s16, 3 }
  0x18   : > { %p817_p0 = pnand %p497_p13, %p788_p4  ;;  %s182_s5 = sand.u32 1, %s723_s17  }
  0x19   : > { %s918_s1 = sld [smem:[#allocation16_spill]]  ;;  %s186_s10 = scalar_lea.vmem [#allocation6], %s459_s29 }
  0x1a   : > { %s195_s11 = sshll.u32 %s186_s10, 4  ;;  %s183_s19 = scalar_lea.sflag [#allocation7], %s182_s5  ;;  %s196_s11 = int_to_ptr.vmem [resolvable:$true] %s195_s11 }
  0x1b   : > { %p465_p1 = scmp.ge.s32.totalorder %s723_s17, 1  ;;  %p220_p2 = scmp.lt.s32.totalorder %s723_s17, 3 }
  0x1c   : > { %s171_s6 = scalar_lea.hbm %s903_s0, %s460_s30  ;;  %s163_s10 = scalar_lea.sflag [#allocation4], %s162_s28 }
  0x1d   : > { %p829_p3 = pnand %p465_p1, %p220_p2  ;;  %s173_s7 = sshll.u32 %s171_s6, 4  ;;  %s174_s7 = int_to_ptr.hbm [resolvable:$true] %s173_s7 }
  0x1e   : > { %s206_s16 = scalar_lea.vmem [#allocation8], %s459_s29  ;;  %s846_s22 = sand.u32 (!%p829_p3), 1, %s707_s13  }
  0x1f   : > { %s191_s8 = scalar_lea.hbm %s918_s1, %s460_s30  ;;  %s215_s26 = sshll.u32 %s206_s16, 4  ;;  %s216_s26 = int_to_ptr.vmem [resolvable:$true] %s215_s26 }
  0x20   : > { %s193_s9 = sshll.u32 %s191_s8, 4  ;;  %s166_s8 = scalar_lea.vmem [#allocation3], %s459_s29  ;;  %s194_s9 = int_to_ptr.hbm [resolvable:$true] %s193_s9 }
  0x21   : > { %489 = dma.hbm_to_vmem [thread:$0]  (!%p817_p0), %s194_s9, 128, %s196_s11, %s183_s19  }
  0x22   : > { %s175_s1 = sshll.u32 %s166_s8, 4  ;;  %s211_s11 = scalar_lea.hbm %s905_s2, %s460_s30  ;;  %s176_s1 = int_to_ptr.vmem [resolvable:$true] %s175_s1 }
  0x23   : > { %486 = dma.hbm_to_vmem [thread:$0]  (!%p817_p0), %s174_s7, 128, %s176_s1, %s163_s10  }
  0x24   : > { %s213_s20 = sshll.u32 %s211_s11, 4  ;;  %224 = sbr.rel (%p829_p3) target bundleno = 60 (0x3c), region = 32  ;;  %s214_s20 = int_to_ptr.hbm [resolvable:$true] %s213_s20 }
  0x25   : > { %492 = dma.hbm_to_vmem [thread:$0]  (!%p817_p0), %s214_s20, 128, %s216_s26, %s183_s19  }
  0x26   : > { %s849_s1 = sshll.u32 (!%p829_p3), %s846_s22, 3  ;;  %s227_s28 = scalar_lea.sflag (!%p829_p3), [#allocation4], %s846_s22 }
  0x27   : > { %s230_s30 = scalar_lea.vmem (!%p829_p3), [#allocation3], %s849_s1 }
  0x29   : > { %690 = dma.done.wait (%p796_p8), %s227_s28, 128  }
  0x2a   : > { %692 = vsyncadd (%p796_p8), %s227_s28, 4294967168  ;;  %s236_s16 = sand.u32 1, %s776_s18   ;;  %s240_s26 = scalar_lea.vmem [#allocation6], %s849_s1 }
  0x2b   : > { %s237_s20 = scalar_lea.sflag [#allocation7], %s236_s16 }
  0x2c   : > { %694 = dma.done.wait (%p796_p8), %s237_s20, 256  }
  0x2d   : > { %696 = vsyncadd (%p796_p8), %s237_s20, 4294967040  ;;  %v300_v0 = vlaneseq  ;;  %s470_s29 = sshll.u32 %s715_s15, 3  ;;  %v292_v3 = vld [vmem:[%s230_s30] sm:$0xff]  ;;  %v293_v4 = vld [vmem:[%s240_s26] sm:$0xff]  ;;  %s250_s4 = scalar_lea.vmem [#allocation8], %s849_s1 }
  0x2e   : > { %v302_v2 = vstv %s470_s29  ;;  %v294_v5 = vld [vmem:[%s250_s4] sm:$0xff]  ;;  %s326_s21 = scalar_lea.hbm %s906_s3, %s470_s29  ;;  %v295_v7 = vsub.f32 %v292_v3, %v293_v4  ;;  %s283_s24 = scalar_lea.vmem [#allocation9], %s849_s1 }
  0x2f   : > { %v301_v1 = vshrl.u32 %v300_v0, 7  ;;  %s328_s23 = sshll.u32 %s283_s24, 4  ;;  %s330_s6 = sshll.u32 %s326_s21, 4  ;;  %s329_s23 = int_to_ptr.vmem [resolvable:$true] %s328_s23  ;;  %s331_s6 = int_to_ptr.hbm [resolvable:$true] %s330_s6 }
  0x30   : > { %v296_v8 = vmul.f32 %v295_v7, %v294_v5  ;;  %s316_s15 = scalar_lea.sflag [#allocation5], %s846_s22  ;;  %s651_s7 = sshra.s32 %s331_s6, 4  ;;  %s652_s7 = int_to_ptr.hbm [resolvable:$true] %s651_s7 }
  0x31   : > { %v303_v6 = vadd.s32 %v302_v2, %v301_v1  ;;  %s653_s8 = scalar_lea.hbm %s652_s7, 8  ;;  %s657_s9 = scalar_lea.hbm %s906_s3, 16 }
  0x32   : > { %v297_v9 = vand.u32 2147483647, %v296_v8  ;;  %p654_p4 = scmp.ne.s32.totalorder %s652_s7, %s653_s8  ;;  %p658_p7 = scmp.lt.s32.totalorder %s652_s7, %s906_s3 }
  0x33   : > { %vm304_vm0 = vcmp.lt.s32.totalorder %v303_v6, 16  ;;  %p659_p8 = scmp.lt.s32.totalorder %s657_s9, %s653_s8 }
  0x34   : > { %v305_v10 = vsel %vm304_vm0, %v297_v9, 0.0  ;;  %p655_p5 = pnand %p654_p4, %p800_p9 }
  0x35   : > { %314 = vst [vmem:[%s283_s24] sm:$0xff] %v305_v10  ;;  %p660_p10 = por %p659_p8, %p658_p7 }
  0x36   : > { %p656_p6 = pneg %p655_p5 }
  0x38   : > { %p661_p13 = pnand %p660_p10, %p656_p6 }
  0x3a   : > { %664 = shalt.err (!%p661_p13)
}
  0x3b   : > { %481 = dma.vmem_to_hbm [thread:$0]  (%p800_p9), %s329_s23, 128, %s331_s6, %s316_s15  }
  0x3c PF: > { %s342_s22 = sand.u32 1, %s703_s12   ;;  %p494_p0 = pnand %p458_p12, %p807_p11 }
  0x3d   : > { %s343_s28 = scalar_lea.sflag [#allocation5], %s342_s22 }
  0x3e   : > { %p495_p1 = pneg %p494_p0 }
  0x40   : > { %698 = dma.done.wait (%p495_p1), %s343_s28, 128  }
  0x41   : > { %700 = vsyncadd (%p495_p1), %s343_s28, 4294967168  ;;  %s22_s17 = sadd.s32 1, %s723_s17   ;;  %s920_s30 = sld [smem:[#allocation15_spill]] }
  0x42   : > { %p19_p2 = scmp.ge.s32.totalorder %s22_s17, 4   ;;  %s921_s15 = sld [smem:[#allocation13_spill]] }
  0x43   : > { %s922_s16 = sld [smem:[#allocation14_spill]]  ;;  %s923_s12 = smov %s707_s13 }
  0x44   : > { %s924_s13 = smov %s711_s14  ;;  %21 = sbr.rel (!%p19_p2) target bundleno = 10 (0xa), region = 109 }
  0x47   : > { %s925_s14 = smov %s920_s30 }
  0x49   :  { %349 = vsyncpa [#allocation4], 1 }
  0x4a   :  { %351 = vsyncpa [#allocation4 + $0x1], 1 }
  0x4b   :  { %352 = vsyncpa [#allocation7], 1 }
  0x4c   :  { %354 = vsyncpa [#allocation7 + $0x1], 1 }
  0x4d   :  { %355 = vsyncpa [#allocation5], 1 }
  0x4e   :  { %357 = vsyncpa [#allocation5 + $0x1], 1 }

</bundles_post_ra>
